<compile_context>
chip_gen: v6e
topology: v6e:2x2x1
jax: 0.10.0
libtpu: 0.0.40
codegen_flags: <defaults>
</compile_context>

<pallas_src>
import numpy as np
import jax
import jax.numpy as jnp
from jax.experimental import pallas as pl
from jax.experimental.pallas import tpu as pltpu

_LANES = 128
_ACC_SUBLANES = 8                       # accumulator is always f32 -> 8 sublanes
_TARGET_CHUNK_BYTES = 2 * 1024 * 1024   # ~2 MiB per input block
_NUM_CORES = 2                          # v7x megacore split; harmless on v5e/v6e


def _cdiv(a, b):
    return -(-a // b)


def _round_up(a, b):
    return _cdiv(a, b) * b


def _atloss_kernel(pair_id_ref, off_ref, first_ref, x_ref, y_ref, o_ref):
    """Grid = (core c [parallel], chunk j [arbitrary / reduction])."""
    c = pl.program_id(0)
    j = pl.program_id(1)

    # New (core, pair) output block starts -> zero the resident accumulator.
    @pl.when(first_ref[c, j] == 1)
    def _():
        o_ref[...] = jnp.zeros_like(o_ref)

    x = x_ref[...].astype(jnp.float32)          # (rows_chunk, 128)
    y = y_ref[...].astype(jnp.float32)
    r = x.shape[0] // _ACC_SUBLANES
    x3 = x.reshape(r, _ACC_SUBLANES, _LANES)    # tile-boundary preserving
    y3 = y.reshape(r, _ACC_SUBLANES, _LANES)

    # VALU-only partial sums into full (8,128) vregs; the cross-sublane /
    # cross-lane collapse happens once, in the wrapper.
    o_ref[0, 0, 0] += jnp.sum(x3 * x3, axis=0)
    o_ref[0, 0, 1] += jnp.sum(y3 * y3, axis=0)
    o_ref[0, 0, 2] += jnp.sum(x3 * y3, axis=0)


def at_loss(f_g_l, f_r_l):
    """Pallas implementation of ATLoss.forward on lists of (B, H, W) arrays."""
    assert len(f_g_l) == len(f_r_l) and len(f_g_l) > 0
    L = len(f_g_l)
    dtype = jnp.result_type(*(a.dtype for a in list(f_g_l) + list(f_r_l)))
    itemsize = jnp.dtype(dtype).itemsize
    sub_mult = 8 * max(1, 4 // itemsize)                 # 8 f32 / 16 bf16 / 32 i8
    max_chunk_rows = max(
        sub_mult,
        (_TARGET_CHUNK_BYTES // (_LANES * itemsize)) // sub_mult * sub_mult)

    sizes = []
    for x, y in zip(f_g_l, f_r_l):
        assert x.size == y.size, "paired feature maps must match in element count"
        sizes.append(int(x.size))

    rows_per_pair = [_cdiv(s, _LANES) for s in sizes]
    max_rows = max(rows_per_pair)

    # --- Balanced chunking (review item 1) ---
    n_chunks_max = _cdiv(max_rows, max_chunk_rows)
    rows_chunk = _round_up(_cdiv(max_rows, n_chunks_max), sub_mult)
    chunks_per_pair = [_cdiv(r, rows_chunk) for r in rows_per_pair]

    # --- Contiguous per-pair packing (review item 2): one lane-dense slab ---
    def pack(arrs):
        slabs = []
        for a, ncp in zip(arrs, chunks_per_pair):
            flat = jnp.reshape(a, (-1,)).astype(dtype)
            pad = ncp * rows_chunk * _LANES - flat.shape[0]
            flat = jnp.pad(flat, (0, pad))               # zeros don't change sums
            slabs.append(flat.reshape(ncp * rows_chunk, _LANES))
        return jnp.concatenate(slabs, axis=0)            # (G*rows_chunk, 128)

    xs = pack(f_g_l)
    ys = pack(f_r_l)

    # --- Per-chunk schedule tables (scalar prefetch -> SMEM) ---
    chunk_pair, chunk_off = [], []
    off = 0
    for p, ncp in enumerate(chunks_per_pair):
        for k in range(ncp):
            chunk_pair.append(p)
            chunk_off.append(off + k)
        off += ncp
    G = len(chunk_pair)
    C = _cdiv(G, _NUM_CORES)
    while len(chunk_pair) < _NUM_CORES * C:              # filler -> dummy row L
        chunk_pair.append(L)
        chunk_off.append(0)

    pair_tbl = np.asarray(chunk_pair, np.int32).reshape(_NUM_CORES, C)
    off_tbl = np.asarray(chunk_off, np.int32).reshape(_NUM_CORES, C)
    first_tbl = np.zeros((_NUM_CORES, C), np.int32)
    for c in range(_NUM_CORES):
        first_tbl[c, 0] = 1
        for j in range(1, C):
            first_tbl[c, j] = int(pair_tbl[c, j] != pair_tbl[c, j - 1])

    def in_map(c, j, pid, off, first):
        return (off[c, j], 0)

    def out_map(c, j, pid, off, first):
        return (c, pid[c, j], 0, 0, 0)

    in_blk = (rows_chunk, _LANES)
    out_spec = pl.BlockSpec((1, 1, 3, _ACC_SUBLANES, _LANES), out_map)
    out_shape = jax.ShapeDtypeStruct(
        (_NUM_CORES, L + 1, 3, _ACC_SUBLANES, _LANES), jnp.float32)

    def run(buffered):
        if buffered and hasattr(pl, "Buffered"):
            try:
                ispecs = [pl.BlockSpec(in_blk, in_map, pipeline_mode=pl.Buffered(3)),
                          pl.BlockSpec(in_blk, in_map, pipeline_mode=pl.Buffered(3))]
            except TypeError:
                ispecs = [pl.BlockSpec(in_blk, in_map), pl.BlockSpec(in_blk, in_map)]
        else:
            ispecs = [pl.BlockSpec(in_blk, in_map), pl.BlockSpec(in_blk, in_map)]
        return pl.pallas_call(
            _atloss_kernel,
            out_shape=out_shape,
            grid_spec=pltpu.PrefetchScalarGridSpec(
                num_scalar_prefetch=3,
                grid=(_NUM_CORES, C),
                in_specs=ispecs,
                out_specs=out_spec,
            ),
            compiler_params=pltpu.CompilerParams(
                dimension_semantics=("parallel", "arbitrary"),
                vmem_limit_bytes=32 * 1024 * 1024),
        )(pair_tbl, off_tbl, first_tbl, xs, ys)

    try:
        out = jax.block_until_ready(run(True))
    except Exception:   # fall back if Buffered(3) is unsupported in this jax
        out = jax.block_until_ready(run(False))

    # --- Tiny static combine: only sum blocks that were actually written ---
    touched = [[False] * L for _ in range(_NUM_CORES)]
    for c in range(_NUM_CORES):
        for j in range(C):
            p = int(pair_tbl[c, j])
            if p < L:
                touched[c][p] = True

    losses = []
    for p in range(L):
        acc = None
        for c in range(_NUM_CORES):
            if touched[c][p]:
                blk = out[c, p]                           # (3, 8, 128) f32
                acc = blk if acc is None else acc + blk
        s = jnp.sum(acc, axis=(1, 2))                     # (sxx, syy, sxy)
        cos = s[2] * jax.lax.rsqrt(s[0] * s[1])           # NaN if a zero-norm map
        # mse_loss(x/nx, y/ny, 'mean') == (2 - 2*cos) / n_elems (exact divisor)
        losses.append((2.0 - 2.0 * cos) * np.float32(1.0 / sizes[p]))
    return jnp.sum(jnp.stack(losses)) / L


def _reference(f_g_l, f_r_l):
    loss = 0.0
    for x, y in zip(f_g_l, f_r_l):
        qx = x.reshape(x.shape[0], -1).astype(jnp.float32)
        qy = y.reshape(y.shape[0], -1).astype(jnp.float32)
        qx = qx / jnp.linalg.norm(qx)
        qy = qy / jnp.linalg.norm(qy)
        loss = loss + jnp.mean((qx - qy) ** 2)
    return loss / len(f_g_l)


if __name__ == "__main__":
    key = jax.random.PRNGKey(0)

    # Test 1: homogeneous pair shapes (B=2, 16x16), 3 pairs, f32.
    B, H, W = 2, 16, 16
    n_pairs = 3
    keys = jax.random.split(key, 2 * n_pairs)
    f_g_l = [jax.random.normal(keys[2 * i], (B, H, W), dtype=jnp.float32)
             for i in range(n_pairs)]
    f_r_l = [jax.random.normal(keys[2 * i + 1], (B, H, W), dtype=jnp.float32)
             for i in range(n_pairs)]
    loss = at_loss(f_g_l, f_r_l)
    jax.block_until_ready(loss)
    ref = _reference(f_g_l, f_r_l)
    assert jnp.allclose(loss, ref, atol=1e-6, rtol=1e-4), (loss, ref)

    # Test 2: heterogeneous per-layer shapes (like a real AT pyramid).
    key2 = jax.random.PRNGKey(1)
    k0, k1, k2, k3 = jax.random.split(key2, 4)
    f_g2 = [jax.random.normal(k0, (2, 16, 16), dtype=jnp.float32),
            jax.random.normal(k1, (2, 8, 8), dtype=jnp.float32)]
    f_r2 = [jax.random.normal(k2, (2, 16, 16), dtype=jnp.float32),
            jax.random.normal(k3, (2, 8, 8), dtype=jnp.float32)]
    loss2 = at_loss(f_g2, f_r2)
    jax.block_until_ready(loss2)
    ref2 = _reference(f_g2, f_r2)
    assert jnp.allclose(loss2, ref2, atol=1e-6, rtol=1e-4), (loss2, ref2)

    # Test 3: bf16 activations (16-row sublane rounding path).
    key3 = jax.random.PRNGKey(2)
    k4, k5, k6, k7 = jax.random.split(key3, 4)
    f_g3 = [jax.random.normal(k4, (2, 16, 16), dtype=jnp.bfloat16),
            jax.random.normal(k5, (2, 8, 8), dtype=jnp.bfloat16)]
    f_r3 = [jax.random.normal(k6, (2, 16, 16), dtype=jnp.bfloat16),
            jax.random.normal(k7, (2, 8, 8), dtype=jnp.bfloat16)]
    loss3 = at_loss(f_g3, f_r3)
    jax.block_until_ready(loss3)
    ref3 = _reference(f_g3, f_r3)
    assert jnp.allclose(loss3, ref3, atol=1e-5, rtol=1e-3), (loss3, ref3)

    print("KERNEL_OK")
</pallas_src>

<mosaic_0001>
module attributes {stable_mosaic.version = 11 : i64} {
  func.func @_atloss_kernel(%arg0: i32, %arg1: i32, %arg2: memref<2x2xi32, #tpu.memory_space<smem>>, %arg3: memref<2x2xi32, #tpu.memory_space<smem>>, %arg4: memref<2x2xi32, #tpu.memory_space<smem>>, %arg5: memref<8x128xf32, #tpu.memory_space<vmem>>, %arg6: memref<8x128xf32, #tpu.memory_space<vmem>>, %arg7: memref<1x1x3x8x128xf32, #tpu.memory_space<vmem>>) attributes {dimension_semantics = [#tpu.dimension_semantics<parallel>, #tpu.dimension_semantics<arbitrary>], iteration_bounds = array<i64: 2, 2>, scalar_prefetch = 3 : i64, scratch_operands = 0 : i64, tpu.core_type = #tpu.core_type<tc>, window_params = [{transform_indices = @transform_0, window_bounds = array<i64: 8, 128>}, {transform_indices = @transform_1, window_bounds = array<i64: 8, 128>}, {transform_indices = @transform_2, window_bounds = array<i64: 1, 1, 3, 8, 128>}]} {
    %0 = arith.index_cast %arg0 : i32 to index
    %1 = arith.index_cast %arg1 : i32 to index
    %2 = memref.load %arg4[%0, %1] : memref<2x2xi32, #tpu.memory_space<smem>>
    %c1_i32 = arith.constant 1 : i32
    %3 = arith.cmpi eq, %2, %c1_i32 : i32
    %4 = arith.extui %3 : i1 to i32
    %c0_i32 = arith.constant 0 : i32
    %5 = arith.cmpi ne, %4, %c0_i32 : i32
    scf.if %5 {
      %cst_33 = arith.constant 0.000000e+00 : f32
      %34 = vector.broadcast %cst_33 : f32 to vector<1x1x3x8x128xf32>
      %c0_34 = arith.constant 0 : index
      %c0_35 = arith.constant 0 : index
      %c0_36 = arith.constant 0 : index
      %c0_37 = arith.constant 0 : index
      %c0_38 = arith.constant 0 : index
      %35 = vector.load %arg7[%c0_34, %c0_35, %c0_36, %c0_37, %c0_38] : memref<1x1x3x8x128xf32, #tpu.memory_space<vmem>>, vector<1x1x3x8x128xf32>
      tpu.vector_store %arg7[%c0_34, %c0_35, %c0_36, %c0_37, %c0_38], %34 {strides = array<i32>} : memref<1x1x3x8x128xf32, #tpu.memory_space<vmem>>, vector<1x1x3x8x128xf32>,
    } else {
    }
    %c0 = arith.constant 0 : index
    %c0_0 = arith.constant 0 : index
    %6 = vector.load %arg5[%c0, %c0_0] : memref<8x128xf32, #tpu.memory_space<vmem>>, vector<8x128xf32>
    %c0_1 = arith.constant 0 : index
    %c0_2 = arith.constant 0 : index
    %7 = vector.load %arg6[%c0_1, %c0_2] : memref<8x128xf32, #tpu.memory_space<vmem>>, vector<8x128xf32>
    %8 = vector.shape_cast %6 : vector<8x128xf32> to vector<1x8x128xf32>
    %9 = vector.shape_cast %7 : vector<8x128xf32> to vector<1x8x128xf32>
    %c0_3 = arith.constant 0 : index
    %c0_4 = arith.constant 0 : index
    %c0_5 = arith.constant 0 : index
    %c0_6 = arith.constant 0 : index
    %c0_7 = arith.constant 0 : index
    %10 = vector.load %arg7[%c0_3, %c0_4, %c0_5, %c0_6, %c0_7] : memref<1x1x3x8x128xf32, #tpu.memory_space<vmem>>, vector<1x1x1x8x128xf32>
    %11 = vector.shape_cast %10 : vector<1x1x1x8x128xf32> to vector<8x128xf32>
    %12 = arith.mulf %8, %8 : vector<1x8x128xf32>
    %cst = arith.constant dense<0.000000e+00> : vector<8x128xf32>
    %13 = vector.multi_reduction <add>, %12, %cst [0] : vector<1x8x128xf32> to vector<8x128xf32>
    %14 = arith.addf %11, %13 : vector<8x128xf32>
    %c0_8 = arith.constant 0 : index
    %c0_9 = arith.constant 0 : index
    %c0_10 = arith.constant 0 : index
    %c0_11 = arith.constant 0 : index
    %c0_12 = arith.constant 0 : index
    %15 = vector.load %arg7[%c0_8, %c0_9, %c0_10, %c0_11, %c0_12] : memref<1x1x3x8x128xf32, #tpu.memory_space<vmem>>, vector<1x1x1x8x128xf32>
    %16 = vector.shape_cast %15 : vector<1x1x1x8x128xf32> to vector<8x128xf32>
    %17 = vector.shape_cast %14 : vector<8x128xf32> to vector<1x1x1x8x128xf32>
    tpu.vector_store %arg7[%c0_8, %c0_9, %c0_10, %c0_11, %c0_12], %17 {strides = array<i32>} : memref<1x1x3x8x128xf32, #tpu.memory_space<vmem>>, vector<1x1x1x8x128xf32>,
    %c0_13 = arith.constant 0 : index
    %c0_14 = arith.constant 0 : index
    %c1 = arith.constant 1 : index
    %c0_15 = arith.constant 0 : index
    %c0_16 = arith.constant 0 : index
    %18 = vector.load %arg7[%c0_13, %c0_14, %c1, %c0_15, %c0_16] : memref<1x1x3x8x128xf32, #tpu.memory_space<vmem>>, vector<1x1x1x8x128xf32>
    %19 = vector.shape_cast %18 : vector<1x1x1x8x128xf32> to vector<8x128xf32>
    %20 = arith.mulf %9, %9 : vector<1x8x128xf32>
    %cst_17 = arith.constant dense<0.000000e+00> : vector<8x128xf32>
    %21 = vector.multi_reduction <add>, %20, %cst_17 [0] : vector<1x8x128xf32> to vector<8x128xf32>
    %22 = arith.addf %19, %21 : vector<8x128xf32>
    %c0_18 = arith.constant 0 : index
    %c0_19 = arith.constant 0 : index
    %c1_20 = arith.constant 1 : index
    %c0_21 = arith.constant 0 : index
    %c0_22 = arith.constant 0 : index
    %23 = vector.load %arg7[%c0_18, %c0_19, %c1_20, %c0_21, %c0_22] : memref<1x1x3x8x128xf32, #tpu.memory_space<vmem>>, vector<1x1x1x8x128xf32>
    %24 = vector.shape_cast %23 : vector<1x1x1x8x128xf32> to vector<8x128xf32>
    %25 = vector.shape_cast %22 : vector<8x128xf32> to vector<1x1x1x8x128xf32>
    tpu.vector_store %arg7[%c0_18, %c0_19, %c1_20, %c0_21, %c0_22], %25 {strides = array<i32>} : memref<1x1x3x8x128xf32, #tpu.memory_space<vmem>>, vector<1x1x1x8x128xf32>,
    %c0_23 = arith.constant 0 : index
    %c0_24 = arith.constant 0 : index
    %c2 = arith.constant 2 : index
    %c0_25 = arith.constant 0 : index
    %c0_26 = arith.constant 0 : index
    %26 = vector.load %arg7[%c0_23, %c0_24, %c2, %c0_25, %c0_26] : memref<1x1x3x8x128xf32, #tpu.memory_space<vmem>>, vector<1x1x1x8x128xf32>
    %27 = vector.shape_cast %26 : vector<1x1x1x8x128xf32> to vector<8x128xf32>
    %28 = arith.mulf %8, %9 : vector<1x8x128xf32>
    %cst_27 = arith.constant dense<0.000000e+00> : vector<8x128xf32>
    %29 = vector.multi_reduction <add>, %28, %cst_27 [0] : vector<1x8x128xf32> to vector<8x128xf32>
    %30 = arith.addf %27, %29 : vector<8x128xf32>
    %c0_28 = arith.constant 0 : index
    %c0_29 = arith.constant 0 : index
    %c2_30 = arith.constant 2 : index
    %c0_31 = arith.constant 0 : index
    %c0_32 = arith.constant 0 : index
    %31 = vector.load %arg7[%c0_28, %c0_29, %c2_30, %c0_31, %c0_32] : memref<1x1x3x8x128xf32, #tpu.memory_space<vmem>>, vector<1x1x1x8x128xf32>
    %32 = vector.shape_cast %31 : vector<1x1x1x8x128xf32> to vector<8x128xf32>
    %33 = vector.shape_cast %30 : vector<8x128xf32> to vector<1x1x1x8x128xf32>
    tpu.vector_store %arg7[%c0_28, %c0_29, %c2_30, %c0_31, %c0_32], %33 {strides = array<i32>} : memref<1x1x3x8x128xf32, #tpu.memory_space<vmem>>, vector<1x1x1x8x128xf32>,
    return
  }
  func.func @transform_0(%arg0: i32, %arg1: i32, %arg2: memref<2x2xi32, #tpu.memory_space<smem>>, %arg3: memref<2x2xi32, #tpu.memory_space<smem>>, %arg4: memref<2x2xi32, #tpu.memory_space<smem>>) -> (i32, i32) {
    %0 = arith.index_cast %arg0 : i32 to index
    %1 = arith.index_cast %arg1 : i32 to index
    %2 = memref.load %arg3[%0, %1] : memref<2x2xi32, #tpu.memory_space<smem>>
    %c0_i32 = arith.constant 0 : i32
    %c0_i32_0 = arith.constant 0 : i32
    return %2, %c0_i32 : i32, i32
  }
  func.func @transform_1(%arg0: i32, %arg1: i32, %arg2: memref<2x2xi32, #tpu.memory_space<smem>>, %arg3: memref<2x2xi32, #tpu.memory_space<smem>>, %arg4: memref<2x2xi32, #tpu.memory_space<smem>>) -> (i32, i32) {
    %0 = arith.index_cast %arg0 : i32 to index
    %1 = arith.index_cast %arg1 : i32 to index
    %2 = memref.load %arg3[%0, %1] : memref<2x2xi32, #tpu.memory_space<smem>>
    %c0_i32 = arith.constant 0 : i32
    %c0_i32_0 = arith.constant 0 : i32
    return %2, %c0_i32 : i32, i32
  }
  func.func @transform_2(%arg0: i32, %arg1: i32, %arg2: memref<2x2xi32, #tpu.memory_space<smem>>, %arg3: memref<2x2xi32, #tpu.memory_space<smem>>, %arg4: memref<2x2xi32, #tpu.memory_space<smem>>) -> (i32, i32, i32, i32, i32) {
    %0 = arith.index_cast %arg0 : i32 to index
    %1 = arith.index_cast %arg1 : i32 to index
    %2 = memref.load %arg2[%0, %1] : memref<2x2xi32, #tpu.memory_space<smem>>
    %c0_i32 = arith.constant 0 : i32
    %c0_i32_0 = arith.constant 0 : i32
    %c0_i32_1 = arith.constant 0 : i32
    %c0_i32_2 = arith.constant 0 : i32
    return %arg0, %2, %c0_i32, %c0_i32_0, %c0_i32_1 : i32, i32, i32, i32, i32
  }
}

</mosaic_0001>

<bundles_post_ra>
// kernel: tpu_custom_call.1
= control target key start
LH: loop header
LB: loop body
LE: loop exit
PB: predicated region body
PF: predicated region fallthrough
CT: control target
= control target key end

     0   :  { %s894_s18 = smov [#allocation3]   ;;  %s895_s21 = smov [#allocation4]   ;;  %s1291_s0 = inlined_call_operand.hbm [shape: s32[2,2], index: 0, kind: input, shape index: {}]   ;;  %s1292_s3 = inlined_call_operand.hbm [shape: f32[24,128], index: 3, kind: input, shape index: {}]   ;;  %s1293_s4 = inlined_call_operand.hbm [shape: f32[24,128], index: 4, kind: input, shape index: {}]   ;;  %s1294_s5 = inlined_call_operand.hbm [shape: f32[2,4,3,8,128], index: 5, kind: output, shape index: {}]   ;;  %s1295_s1 = inlined_call_operand.hbm [shape: s32[2,2], index: 1, kind: input, shape index: {}]   ;;  %s1296_s2 = inlined_call_operand.vmem [shape: s32[2,2], index: 2, kind: input, shape index: {}]  }
   0x1   :  { %1315 = sst [smem:[#allocation32_spill]] %s1294_s5  ;;  %s14_s26 = sshll.u32 %s1296_s2, 4  ;;  %s15_s26 = int_to_ptr.vmem [resolvable:$true] %s14_s26 }
   0x2   :  { %11 = dma.hbm_to_smem %s1291_s0, 32, %s894_s18, [#allocation2] }
   0x3   :  { %13 = dma.hbm_to_smem %s1295_s1, 32, %s895_s21, [#allocation2] }
   0x4   :  { %s674_s27 = scalar_lea.vmem %s15_s26, 32  ;;  %p679_p1 = scmp.lt.s32.totalorder %s15_s26, %s15_s26 }
   0x5   :  { %p675_p0 = scmp.ne.s32.totalorder %s15_s26, %s674_s27  ;;  %p680_p2 = scmp.lt.s32.totalorder %s674_s27, %s674_s27 }
   0x7   :  { %p681_p3 = por %p680_p2, %p679_p1 }
   0x9   :  { %p682_p4 = pnand %p681_p3, %p675_p0 }
   0xb   :  { %685 = shalt.err (!%p682_p4)  }
   0xc   :  { %s896_s28 = smov [#allocation5]  }
   0xd   :  { %17 = dma.vmem_to_smem %s15_s26, 32, %s896_s28, [#allocation2] }
   0xe   :  { %824 = dma.done.wait [#allocation2], 96 }
   0xf   :  { %825 = vsyncadd [#allocation2], 4294967200 }
  0x10   :  { %19 = sfence }
  0x11   :  { %20 = vsyncpa [#allocation7], 0 }
  0x12   :  { %22 = vsyncpa [#allocation7 + $0x1], 0 }
  0x13   :  { %23 = vsyncpa [#allocation10], 0 }
  0x14   :  { %25 = vsyncpa [#allocation10 + $0x1], 0 }
  0x15   :  { %26 = vsyncpa [#allocation8], 0 }
  0x16   :  { %28 = vsyncpa [#allocation8 + $0x1], 0  ;;  %s942_s0 = smov 0   ;;  %s944_s1 = smov 0  }
  0x17   :  { %s946_s2 = smov 0   ;;  %s948_s29 = smov 0  }
  0x18   :  { %s950_s30 = smov 0   ;;  %s952_s6 = smov 0  }
  0x19   :  { %s954_s7 = smov 0   ;;  %s956_s8 = smov 0  }
  0x1a   :  { %s958_s9 = smov 0   ;;  %s960_s10 = smov 0  }
  0x1b   :  { %s962_s11 = smov 0   ;;  %s964_s12 = smov 0  }
  0x1c   :  { %s966_s13 = smov 0   ;;  %s968_s14 = smov 0  }
  0x1d LB: > { %1316 = sst [smem:[#allocation21_spill]] %s840_s0  ;;  %s1297_s15 = sadd.s32 4294967295, %s892_s14   ;;  %s892_s14 = sphi %s968_s14, %s34_s14   ;;  %s888_s13 = sphi %s966_s13, %s1363_s13   ;;  %s884_s12 = sphi %s964_s12, %s1362_s12   ;;  %s880_s11 = sphi %s962_s11, %s1361_s11   ;;  %s876_s10 = sphi %s960_s10, %s1360_s10   ;;  %s872_s9 = sphi %s958_s9, %s1359_s9   ;;  %s868_s8 = sphi %s956_s8, %s1371_s8   ;;  %s864_s7 = sphi %s954_s7, %s1370_s7   ;;  %s860_s6 = sphi %s952_s6, %s1369_s6   ;;  %s856_s30 = sphi %s950_s30, %s1368_s30   ;;  %s852_s29 = sphi %s948_s29, %s1367_s29   ;;  %s848_s2 = sphi %s946_s2, %s1366_s2   ;;  %s844_s1 = sphi %s944_s1, %s1365_s1   ;;  %s840_s0 = sphi %s942_s0, %s1354_s0  }
  0x1e   : > { %1317 = sst [smem:[#allocation22_spill]] %s844_s1  ;;  %s43_s16 = sadd.s32 1, %s884_s12 }
  0x1f   : > { %1318 = sst [smem:[#allocation23_spill]] %s848_s2  ;;  %s46_s17 = sadd.s32 1, %s888_s13 }
  0x20   : > { %1319 = sst [smem:[#allocation24_spill]] %s872_s9  ;;  %p44_p5 = scmp.ge.s32.totalorder %s43_s16, 2 }
  0x21   : > { %1320 = sst [smem:[#allocation25_spill]] %s884_s12  ;;  %s50_s18 = sshra.s32 %s884_s12, 7 }
  0x22   : > { %1321 = sst [smem:[#allocation26_spill]] %s888_s13  ;;  %s52_s19 = sadd.s32 %s888_s13, %s50_s18 }
  0x23   : > { %s55_s20 = sand.u32 127, %s884_s12  ;;  %s1373_s16 = smov (%p44_p5, %s43_s16), 0 }
  0x24   : > { %1322 = sst [smem:[#allocation27_spill]] %s1373_s16  ;;  %s1375_s17 = smov (!%p44_p5, %s46_s17), %s888_s13 }
  0x25   : > { %s480_s21 = sadd.s32 4294967294, %s892_s14   ;;  %s481_s22 = sshll.u32 %s52_s19, 7 }
  0x26   : > { %p48_p6 = scmp.ge.s32.totalorder %s1375_s17, 2  ;;  %s1022_s23 = sadd.s32 %s481_s22, %s55_s20 }
  0x27   : > { %s57_s24 = sld [smem:[#allocation4 + %s1022_s23]]  ;;  %s58_s25 = sshra.s32 %s1373_s16, 7 }
  0x28   : > { %s1377_s17 = smov (%p48_p6, %s1375_s17), 0  ;;  %s63_s26 = sand.u32 127, %s1373_s16 }
  0x29   : > { %1323 = sst [smem:[#allocation28_spill]] %s1377_s17  ;;  %p76_p7 = scmp.ne.s32.totalorder %s872_s9, %s868_s8 }
  0x2a   : > { %s60_s27 = sadd.s32 %s58_s25, %s1377_s17  ;;  %p1310_p8 = scmp.eq.s32.totalorder %s892_s14, 0 }
  0x2b   : > { %s482_s28 = sshll.u32 %s60_s27, 7  ;;  %p82_p9 = scmp.ne.s32.totalorder %s868_s8, %s864_s7 }
  0x2c   : > { %s1035_s18 = sadd.s32 %s482_s28, %s63_s26  ;;  %s69_s19 = sadd.s32 1, %s872_s9 }
  0x2d   : > { %s65_s20 = sld [smem:[#allocation4 + %s1035_s18]]  ;;  %p1041_p10 = scmp.eq.s32.totalorder %s1297_s15, 0 }
  0x2e   : > { %p1047_p11 = por %p1310_p8, %p76_p7  ;;  %s1052_s7 = sld [smem:[#allocation4 + %s1022_s23]] }
  0x2f   : > { %s1324_s22 = scalar_select %p1041_p10, 1, 0 }
  0x30   : > { %p1056_p12 = por %p1041_p10, %p82_p9  ;;  %s141_s27 = sld [smem:[#allocation3 + %s1022_s23]] }
  0x31   : > { %s149_s28 = sld [smem:[#allocation3 + %s1035_s18]]  ;;  %s150_s15 = ssub.s32 %s888_s13, %s1377_s17 }
  0x32   : > { %s1326_s26 = scalar_select %p1056_p12, 1, 0 }
  0x33   : > { %p165_p13 = scmp.ne.s32.totalorder %s848_s2, %s844_s1  ;;  %s1327_s16 = sadd.s32 4294967295, %s892_s14  }
  0x34   : > { %p166_p0 = scmp.eq.s32.totalorder %s1327_s16, 3  ;;  %p171_p1 = scmp.ne.s32.totalorder %s844_s1, %s840_s0 }
  0x35   : > { %p172_p2 = scmp.eq.s32.totalorder %s480_s21, 3  ;;  %s66_s12 = ssub.s32 %s57_s24, %s65_s20 }
  0x36   : > { %p1070_p3 = por %p166_p0, %p165_p13  ;;  %p67_p4 = scmp.eq.s32.totalorder %s66_s12, 0 }
  0x37   : > { %p1074_p5 = por %p172_p2, %p171_p1  ;;  %s155_s13 = sadd.s32 1, %s848_s2 }
  0x38   : > { %s1328_s5 = scalar_select %p1070_p3, 1, 0 }
  0x39   : > { %s1329_s17 = scalar_select %p1074_p5, 1, 0 }
  0x3a   : > { %s1080_s16 = scalar_select %p67_p4, %s872_s9, %s69_s19  }
  0x3b   : > { %1330 = sst [smem:[#allocation29_spill]] %s1329_s17  ;;  %s151_s0 = ssub.s32 %s141_s27, %s149_s28 }
  0x3c   : > { %1331 = sst [smem:[#allocation30_spill]] %s1080_s16  ;;  %s192_s21 = sand.u32 1, %s872_s9  }
  0x3d   : > { %s152_s1 = sor.u32 %s151_s0, %s150_s15  ;;  %p1309_p6 = scmp.lt.s32.totalorder %s892_s14, 4 }
  0x3e   : > { %p153_p7 = scmp.eq.s32.totalorder %s152_s1, 0  ;;  %s489_s24 = sshll.u32 %s192_s21, 3 }
  0x3f   : > { %p1088_p9 = pnand %p1309_p6, %p1047_p11  ;;  %s196_s1 = scalar_lea.vmem [#allocation6], %s489_s24 }
  0x40   : > { %s1093_s20 = scalar_select %p153_p7, %s848_s2, %s155_s13  }
  0x41   : > { %s511_s19 = scalar_select %p1047_p11, [#allocation4], [#allocation12] }
  0x42   : > { %1333 = sst [smem:[#allocation31_spill]] %s1093_s20  ;;  %s211_s15 = sshll.u32 %s196_s1, 4  ;;  %s1110_s15 = int_to_ptr.vmem [resolvable:$true] %s211_s15 }
  0x43   : > { %s512_s27 = scalar_select %p1047_p11, %s1022_s23, 0 }
  0x44   : > { %s1379_s19 = smov (!%p1309_p6, %s511_s19), [#allocation15]  ;;  %p495_p13 = scmp.ge.s32.totalorder %s892_s14, 1 }
  0x45   : > { %s1381_s27 = smov (!%p1309_p6, %s512_s27), 0  ;;  %p242_p0 = scmp.lt.s32.totalorder %s892_s14, 5 }
  0x46   : > { %s204_s0 = sld [smem:[%s1379_s19 + %s1381_s27]]  ;;  %s193_s2 = scalar_lea.sflag [#allocation7], %s192_s21 }
  0x47   : > { %p1106_p1 = pnand %p495_p13, %p242_p0  ;;  %s1113_s13 = sld [smem:[#allocation4 + %s1035_s18]] }
  0x48   : > { %p688_p4 = pneg %p1088_p9  ;;  %s691_s1 = scalar_lea.hbm %s1292_s3, 384 }
  0x49   : > { %s1334_s28 = scalar_select %p1106_p1, 1, 0 }
  0x4c   : > { %s491_s25 = sshll.u32 %s204_s0, 7 }
  0x4d   : > { %s209_s20 = scalar_lea.hbm %s1292_s3, %s491_s25 }
  0x4e   : > { %s686_s19 = scalar_lea.hbm %s209_s20, 128  ;;  %p692_p0 = scmp.lt.s32.totalorder %s209_s20, %s1292_s3 }
  0x4f   : > { %p687_p2 = scmp.ne.s32.totalorder %s209_s20, %s686_s19  ;;  %p693_p6 = scmp.lt.s32.totalorder %s691_s1, %s686_s19 }
  0x51   : > { %p689_p7 = pnand %p688_p4, %p687_p2  ;;  %p694_p8 = por %p693_p6, %p692_p0 }
  0x53   : > { %p690_p13 = pneg %p689_p7 }
  0x55   : > { %p695_p5 = pnand %p694_p8, %p690_p13 }
  0x57   : > { %698 = shalt.err (!%p695_p5)
}
  0x58   : > { %s699_s9 = scalar_lea.vmem %s1110_s15, 128  ;;  %s897_s16 = smov [#allocation6]  }
  0x59   : > { %p700_p11 = scmp.ne.s32.totalorder %s1110_s15, %s699_s9  ;;  %s704_s21 = sshll.u32 %s897_s16, 4  ;;  %s705_s21 = int_to_ptr.vmem [resolvable:$false] %s704_s21 }
  0x5a   : > { %s706_s0 = scalar_lea.vmem %s705_s21, 256  ;;  %p707_p7 = scmp.lt.s32.totalorder %s1110_s15, %s705_s21 }
  0x5b   : > { %p702_p3 = pnand %p700_p11, %p688_p4  ;;  %p708_p12 = scmp.lt.s32.totalorder %s706_s0, %s699_s9 }
  0x5d   : > { %p703_p2 = pneg %p702_p3  ;;  %p709_p1 = por %p708_p12, %p707_p7 }
  0x5f   : > { %p710_p10 = pnand %p709_p1, %p703_p2 }
  0x61   : > { %713 = shalt.err (!%p710_p10)
}
  0x62   : > { %528 = dma.hbm_to_vmem [thread:$0]  (!%p1088_p9), %s209_s20, 128, %s1110_s15, %s193_s2  }
  0x63   : > { %p124_p8 = scmp.ne.s32.totalorder %s856_s30, %s852_s29  ;;  %s111_s17 = sadd.s32 1, %s860_s6 }
  0x64   : > { %p1335_p10 = scmp.eq.s32.totalorder %s892_s14, 0  ;;  %p1336_p12 = scmp.ne.s32.totalorder %s860_s6, %s856_s30 }
  0x65   : > { %s108_s12 = ssub.s32 %s1052_s7, %s1113_s13  ;;  %p1337_p5 = scmp.ne.s32.totalorder %s1324_s22, 0 }
  0x66   : > { %p120_p3 = por %p1336_p12, %p1335_p10  ;;  %p109_p1 = scmp.eq.s32.totalorder %s108_s12, 0 }
  0x67   : > { %p1146_p6 = por %p124_p8, %p1337_p5  ;;  %s218_s19 = sand.u32 1, %s860_s6  }
  0x68   : > { %p1339_p11 = scmp.lt.s32.totalorder %s892_s14, 4  ;;  %s492_s29 = sshll.u32 %s218_s19, 3 }
  0x69   : > { %s1338_s25 = scalar_select %p1146_p6, 1, 0 }
  0x6a   : > { %p1153_p4 = pnand %p1339_p11, %p120_p3  ;;  %s1383_s23 = smov (!%p120_p3, %s1022_s23), 0 }
  0x6b   : > { %s1158_s2 = scalar_select %p109_p1, %s860_s6, %s111_s17  }
  0x6c   : > { %s514_s20 = scalar_select %p120_p3, [#allocation4], [#allocation13] }
  0x6d   : > { %p1341_p9 = pmov %p1339_p11  ;;  %s222_s7 = scalar_lea.vmem [#allocation9], %s492_s29 }
  0x6e   : > { %s237_s15 = sshll.u32 %s222_s7, 4  ;;  %s219_s9 = scalar_lea.sflag [#allocation10], %s218_s19  ;;  %s1165_s15 = int_to_ptr.vmem [resolvable:$true] %s237_s15 }
  0x6f   : > { %s1385_s20 = smov (!%p1341_p9, %s514_s20), [#allocation16]  ;;  %p1342_p13 = pmov %p1341_p9 }
  0x70   : > { %p716_p2 = pneg %p1153_p4 }
  0x71   : > { %s1387_s23 = smov (!%p1342_p13, %s1383_s23), 0 }
  0x72   : > { %s230_s22 = sld [smem:[%s1385_s20 + %s1387_s23]]  ;;  %s719_s23 = scalar_lea.hbm %s1293_s4, 384 }
  0x78   : > { %s494_s13 = sshll.u32 %s230_s22, 7 }
  0x79   : > { %s235_s18 = scalar_lea.hbm %s1293_s4, %s494_s13 }
  0x7a   : > { %s714_s16 = scalar_lea.hbm %s235_s18, 128  ;;  %p720_p10 = scmp.lt.s32.totalorder %s235_s18, %s1293_s4 }
  0x7b   : > { %p715_p0 = scmp.ne.s32.totalorder %s235_s18, %s714_s16  ;;  %p721_p12 = scmp.lt.s32.totalorder %s719_s23, %s714_s16 }
  0x7d   : > { %p717_p7 = pnand %p716_p2, %p715_p0  ;;  %p722_p3 = por %p721_p12, %p720_p10 }
  0x7f   : > { %p718_p8 = pneg %p717_p7 }
  0x81   : > { %p723_p5 = pnand %p722_p3, %p718_p8 }
  0x83   : > { %726 = shalt.err (!%p723_p5)
}
  0x84   : > { %s727_s19 = scalar_lea.vmem %s1165_s15, 128  ;;  %s898_s29 = smov [#allocation9]  }
  0x85   : > { %p728_p1 = scmp.ne.s32.totalorder %s1165_s15, %s727_s19  ;;  %s732_s20 = sshll.u32 %s898_s29, 4  ;;  %s733_s20 = int_to_ptr.vmem [resolvable:$false] %s732_s20 }
  0x86   : > { %s734_s22 = scalar_lea.vmem %s733_s20, 256  ;;  %p735_p13 = scmp.lt.s32.totalorder %s1165_s15, %s733_s20 }
  0x87   : > { %p730_p11 = pnand %p728_p1, %p716_p2  ;;  %p736_p0 = scmp.lt.s32.totalorder %s734_s22, %s727_s19 }
  0x89   : > { %p731_p9 = pneg %p730_p11  ;;  %p737_p7 = por %p736_p0, %p735_p13 }
  0x8b   : > { %p738_p6 = pnand %p737_p7, %p731_p9 }
  0x8d   : > { %741 = shalt.err (!%p738_p6)
}
  0x8e   : > { %533 = dma.hbm_to_vmem [thread:$0]  (!%p1153_p4), %s235_s18, 128, %s1165_s15, %s219_s9  }
  0x8f   : > { %p1343_p8 = scmp.ne.s32.totalorder %s1334_s28, 0 }
  0x90   : > { %s248_s7 = sand.u32 (!%p1343_p8), 1, %s868_s8   ;;  %p1344_p2 = scmp.ne.s32.totalorder (!%p1343_p8), %s1326_s26, 0 }
  0x91   : > { %246 = sbr.rel (%p1343_p8) target bundleno = 203 (0xcb), region = 28  ;;  %s496_s13 = sshll.u32 (!%p1343_p8), %s248_s7, 3 }
  0x92   : > { %s249_s27 = scalar_lea.sflag (!%p1343_p8), [#allocation7], %s248_s7  ;;  %s252_s1 = scalar_lea.vmem (!%p1343_p8), [#allocation6], %s496_s13 }
  0x96   : > { %827 = dma.done.wait (%p1344_p2), %s249_s27, 128  }
  0x97   : > { %829 = vsyncadd (%p1344_p2), %s249_s27, 4294967168  ;;  %s257_s16 = sand.u32 1, %s856_s30   ;;  %p1345_p6 = scmp.ne.s32.totalorder %s1338_s25, 0 }
  0x98   : > { %s497_s24 = sshll.u32 %s257_s16, 3  ;;  %s258_s21 = scalar_lea.sflag [#allocation10], %s257_s16 }
  0x99   : > { %s261_s15 = scalar_lea.vmem [#allocation9], %s497_s24 }
  0x9a   : > { %831 = dma.done.wait (%p1345_p6), %s258_s21, 128  }
  0x9b   : > { %833 = vsyncadd (%p1345_p6), %s258_s21, 4294967168  ;;  %s1346_s28 = sld [smem:[#allocation22_spill]]  ;;  %s311_s18 = sshra.s32 %s876_s10, 7 }
  0x9c   : > { %s316_s9 = sand.u32 127, %s876_s10  ;;  %s313_s26 = sadd.s32 %s880_s11, %s311_s18 }
  0x9d   : > { %s498_s23 = sshll.u32 %s313_s26, 7 }
  0x9e   : > { %s317_s12 = sadd.s32 %s498_s23, %s316_s9 }
  0x9f   : > { %s318_s19 = sld [smem:[#allocation5 + %s317_s12]] }
  0xa1   : > { %s284_s0 = sand.u32 1, %s1346_s28  }
  0xa2   : > { %s508_s17 = smul.u32 24, %s284_s0 }
  0xa4   : > { %s286_s29 = scalar_lea.vmem [#allocation11], %s508_s17 }
  0xa5   : > { %p499_p4 = scmp.ne.s32.totalorder %s318_s19, 1 }
  0xa7   : > { %322 = sbr.rel (%p499_p4) target bundleno = 175 (0xaf), region = 40 }
  0xac   : > { %v899_v0 = vmov 0.0  }
  0xad   : > { %323 = vst [vmem:[%s286_s29] sm:$0xff] %v899_v0  ;;  %324 = vst [vmem:[%s286_s29 + $0x8] sm:$0xff] %v899_v0 }
  0xae   : > { %325 = vst [vmem:[%s286_s29 + $0x10] sm:$0xff] %v899_v0 }
  0xaf PF: > { %v326_v1 = vld [vmem:[%s252_s1] sm:$0xff]  ;;  %v327_v3 = vld [vmem:[%s261_s15] sm:$0xff]  ;;  %p1347_p10 = scmp.ne.s32.totalorder %s1328_s5, 0  ;;  %s510_s22 = smul.u32 12, %s880_s11 }
  0xb0   : > { %v329_v4 = vmul.f32 %v326_v1, %v326_v1  ;;  %v335_v6 = vmul.f32 %v327_v3, %v327_v3  ;;  %v341_v8 = vmul.f32 %v327_v3, %v326_v1  ;;  %s369_s7 = sshll.u32 %s286_s29, 4  ;;  %s1349_s21 = sld [smem:[#allocation32_spill]]  ;;  %s1207_s7 = int_to_ptr.vmem [resolvable:$true] %s369_s7 }
  0xb1   : > { %s519_s10 = scalar_select %p1347_p10, [#allocation3], [#allocation14] }
  0xb2   : > { %s1389_s12 = smov (!%p1347_p10, %s317_s12), 0  ;;  %s1216_s28 = scalar_lea.sflag [#allocation8], %s284_s0 }
  0xb3   : > { %s360_s20 = sld [smem:[%s519_s10 + %s1389_s12]]  ;;  %s742_s18 = scalar_lea.vmem %s1207_s7, 384 }
  0xb4   : > { %v328_v2 = vld [vmem:[%s286_s29] sm:$0xff]  ;;  %v500_v5 = vld [vmem:[%s286_s29 + $0x8] sm:$0xff]  ;;  %p743_p12 = scmp.ne.s32.totalorder %s1207_s7, %s742_s18  ;;  %s900_s11 = smov [#allocation11]  }
  0xb5   : > { %v502_v7 = vld [vmem:[%s286_s29 + $0x10] sm:$0xff]  ;;  %v331_v9 = vadd.f32 %v329_v4, %v328_v2  ;;  %v337_v10 = vadd.f32 %v500_v5, %v335_v6  ;;  %s746_s9 = sshll.u32 %s900_s11, 4  ;;  %s747_s9 = int_to_ptr.vmem [resolvable:$false] %s746_s9 }
  0xb6   : > { %v343_v11 = vadd.f32 %v502_v7, %v341_v8  ;;  %p744_p3 = pnand %p743_p12, %p1347_p10  ;;  %s748_s26 = scalar_lea.vmem %s747_s9, 768 }
  0xb7   : > { %332 = vst [vmem:[%s286_s29] sm:$0xff] %v331_v9  ;;  %501 = vst [vmem:[%s286_s29 + $0x8] sm:$0xff] %v337_v10  ;;  %p749_p1 = scmp.lt.s32.totalorder %s1207_s7, %s747_s9  ;;  %p750_p11 = scmp.lt.s32.totalorder %s748_s26, %s742_s18 }
  0xb8   : > { %503 = vst [vmem:[%s286_s29 + $0x10] sm:$0xff] %v343_v11  ;;  %p745_p5 = pneg %p744_p3 }
  0xb9   : > { %s509_s13 = smul.u32 3, %s360_s20  ;;  %p751_p9 = por %p750_p11, %p749_p1 }
  0xbb   : > { %s366_s27 = sadd.s32 %s510_s22, %s509_s13  ;;  %p752_p13 = pnand %p751_p9, %p745_p5 }
  0xbc   : > { %s505_s1 = sshll.u32 %s366_s27, 7 }
  0xbd   : > { %s1212_s15 = scalar_lea.hbm %s1349_s21, %s505_s1 }
  0xbe   : > { %755 = shalt.err (!%p752_p13)
}
  0xbf   : > { %s756_s0 = scalar_lea.hbm %s1212_s15, 384  ;;  %s760_s12 = scalar_lea.hbm %s1349_s21, 3072 }
  0xc0   : > { %p757_p0 = scmp.ne.s32.totalorder %s1212_s15, %s756_s0  ;;  %p761_p2 = scmp.lt.s32.totalorder %s1212_s15, %s1349_s21 }
  0xc1   : > { %p762_p6 = scmp.lt.s32.totalorder %s760_s12, %s756_s0 }
  0xc2   : > { %p758_p7 = pnand %p757_p0, %p1347_p10 }
  0xc3   : > { %p763_p4 = por %p762_p6, %p761_p2 }
  0xc4   : > { %p759_p8 = pneg %p758_p7 }
  0xc6   : > { %p764_p12 = pnand %p763_p4, %p759_p8 }
  0xc8   : > { %767 = shalt.err (!%p764_p12)
}
  0xc9   : > { %s901_s10 = smov 128   ;;  %s902_s25 = smov 8  }
  0xca   : > { %521 = dma.vmem_to_hbm [thread:$0]  (%p1347_p10), %s1207_s7, 384, %s1212_s15, %s1216_s28, %s901_s10, %s901_s10, %s902_s25  }
  0xcb PF: > { %s1350_s20 = sld [smem:[#allocation21_spill]]  ;;  %p539_p3 = scmp.ge.s32.totalorder %s892_s14, 2 }
  0xcc   : > { %s1351_s22 = sld [smem:[#allocation29_spill]] }
  0xd1   : > { %s384_s13 = sand.u32 1, %s1350_s20  }
  0xd2   : > { %p1352_p5 = scmp.ne.s32.totalorder %s1351_s22, 0  ;;  %s385_s27 = scalar_lea.sflag [#allocation8], %s384_s13 }
  0xd4   : > { %p535_p1 = pnand %p539_p3, %p1352_p5 }
  0xd6   : > { %p536_p11 = pneg %p535_p1 }
  0xd8   : > { %835 = dma.done.wait (%p536_p11), %s385_s27, 384  }
  0xd9   : > { %837 = vsyncadd (%p536_p11), %s385_s27, 4294966912  ;;  %s34_s14 = sadd.s32 1, %s892_s14   ;;  %s1354_s0 = sld [smem:[#allocation22_spill]] }
  0xda   : > { %p1244_p9 = scmp.ge.s32.totalorder %s34_s14, 6   ;;  %s1355_s5 = sld [smem:[#allocation23_spill]] }
  0xdb   : > { %s1356_s7 = sld [smem:[#allocation31_spill]]  ;;  %s1357_s16 = smov %s1158_s2 }
  0xdc   : > { %s1358_s24 = sld [smem:[#allocation24_spill]]  ;;  %s1367_s29 = smov %s856_s30 }
  0xdd   : > { %s1359_s9 = sld [smem:[#allocation30_spill]]  ;;  %s1368_s30 = smov %s860_s6 }
  0xde   : > { %s1360_s10 = sld [smem:[#allocation25_spill]]  ;;  %s1369_s6 = smov %s1357_s16 }
  0xdf   : > { %s1361_s11 = sld [smem:[#allocation26_spill]]  ;;  %33 = sbr.rel (!%p1244_p9) target bundleno = 29 (0x1d), region = 92 }
  0xe0   : > { %s1362_s12 = sld [smem:[#allocation27_spill]]  ;;  %s1365_s1 = smov %s1355_s5 }
  0xe1   : > { %s1363_s13 = sld [smem:[#allocation28_spill]]  ;;  %s1366_s2 = smov %s1356_s7 }
  0xe2   : > { %s1370_s7 = smov %s868_s8  ;;  %s1371_s8 = smov %s1358_s24 }
  0xe4   :  { %390 = vsyncpa [#allocation7], 1 }
  0xe5   :  { %392 = vsyncpa [#allocation7 + $0x1], 1 }
  0xe6   :  { %393 = vsyncpa [#allocation10], 1 }
  0xe7   :  { %395 = vsyncpa [#allocation10 + $0x1], 1 }
  0xe8   :  { %396 = vsyncpa [#allocation8], 1 }
  0xe9   :  { %398 = vsyncpa [#allocation8 + $0x1], 1 }

</bundles_post_ra>
